<compile_context>
chip_gen: v7x
topology: tpu7x:2x2x1
jax: 0.10.0
libtpu: 0.0.40
codegen_flags: <defaults>
</compile_context>

<pallas_src>
import functools

import jax
import jax.numpy as jnp
from jax import lax
from jax.experimental import pallas as pl
from jax.experimental.pallas import tpu as pltpu

# ---- static problem sizes (small, consistent with the module's forward) ----
B, C1, H, W = 2, 4, 16, 16       # batch of 16x16 feature maps with 4 channels
C2 = 8                           # number of classes (1x1 conv output channels)
NEG_SLOPE = 1.0 / 64.0           # Conv's default act: LeakyReLU(1/64)


# ---------------------------------------------------------------------------
# Fused kernel: AdaptiveAvgPool2d(1) + 1x1 conv (bias=False) + LeakyReLU(1/64)
#   x_ref : (B, C1, H*W)  spatial axis on lanes (multiple of 128)
#   w_ref : (C2, C1)      raw conv weight -- no wrapper-side transform
#   o_ref : (B, C2)       flattened output
# ---------------------------------------------------------------------------
def _classify_kernel(x_ref, w_ref, out_ref, *, inv_hw):
    # Adaptive average pool to 1x1: dense cross-lane sum over H*W, then one VPU
    # multiply by 1/(H*W) on the tiny pooled vreg (exact mean for pow-2 H*W).
    z = jnp.sum(x_ref[...], axis=-1) * inv_hw                        # (B, C1)

    # 1x1 conv, bias=False, on a 1x1 spatial map == matmul.  Contract z's C1
    # axis directly against w's C1 axis (rhs-transposed contraction), so the
    # (C2, C1) weight is used as-is -- no transpose in the wrapper or kernel.
    y = lax.dot_general(
        z, w_ref[...],
        dimension_numbers=(((1,), (1,)), ((), ())),
        preferred_element_type=jnp.float32)                          # (B, C2)

    # LeakyReLU(negative_slope=1/64); Flatten is just the (B, C2) output shape.
    out_ref[...] = jnp.where(y >= 0.0, y, y * NEG_SLOPE)


# ---------------------------------------------------------------------------
# Wrapper
# ---------------------------------------------------------------------------
def classify_forward(x, w_conv):
    """Classify.forward (k=1, s=1 defaults of the module).

    x      : (B, C1, H, W) float32, or a list of such tensors with EQUAL spatial
             dims (then torch.cat of per-tensor pools == pool of channel concat).
    w_conv : (C2, C1) float32 -- the 1x1 conv weight (bias=False).
    Returns (B, C2) float32.
    """
    if isinstance(x, (list, tuple)):
        spatial = {tuple(t.shape[-2:]) for t in x}
        assert len(spatial) == 1, (
            "list inputs must share the same HxW; per-tensor AdaptiveAvgPool2d "
            "with heterogeneous spatial sizes is not fused here")
        # TODO(synk): support heterogeneous spatial sizes (pool each tensor
        # separately before concatenation) if ever needed.
        x = jnp.concatenate(list(x), axis=1)

    b, c1, h, w = x.shape
    c2 = w_conv.shape[0]
    assert w_conv.shape == (c2, c1)

    # Lane-dense layout: put the H*W spatial axis last.  Contiguous row-major
    # reshape -> pure metadata, no extra XLA compute op.
    x3 = x.reshape(b, c1, h * w)

    kernel = functools.partial(_classify_kernel, inv_hw=1.0 / float(h * w))

    return pl.pallas_call(
        kernel,
        out_shape=jax.ShapeDtypeStruct((b, c2), jnp.float32),
        in_specs=[
            pl.BlockSpec(memory_space=pltpu.MemorySpace.VMEM),
            pl.BlockSpec(memory_space=pltpu.MemorySpace.VMEM),
        ],
        out_specs=pl.BlockSpec(memory_space=pltpu.MemorySpace.VMEM),
    )(x3, w_conv)

    # TODO(synk): for real Classify sizes (C1 ~ 512-1280, large B), switch to a
    # grid over B (+ an H*W reduction axis) with BlockSpec pipelining, bf16
    # inputs, and v7x-sized tiles; pointless at this toy, latency-bound shape.


def init_params(key):
    """Deterministic synthetic 1x1 conv weight (C2, C1), bias=False."""
    return 0.1 * jax.random.normal(key, (C2, C1), jnp.float32)


if __name__ == "__main__":
    key = jax.random.PRNGKey(0)
    k_img, k_par = jax.random.split(key)

    x = jax.random.normal(k_img, (B, C1, H, W), jnp.float32)
    w_conv = init_params(k_par)

    out = classify_forward(x, w_conv)
    out = jax.block_until_ready(out)

    # Pure-JAX reference: flatten(LeakyReLU(conv1x1(avgpool(x)), 1/64))
    z_ref = jnp.mean(x, axis=(2, 3))                        # (B, C1)
    y_ref = z_ref @ w_conv.T                                # (B, C2)
    ref = jnp.where(y_ref >= 0.0, y_ref, y_ref * NEG_SLOPE)

    assert out.shape == (B, C2)
    assert jnp.allclose(out, ref, rtol=1e-5, atol=1e-6), "mismatch vs reference"
    print("KERNEL_OK")
</pallas_src>

<mosaic_0001>
module attributes {stable_mosaic.version = 11 : i64} {
  func.func @_classify_kernel(%arg0: memref<2x4x256xf32, #tpu.memory_space<vmem>>, %arg1: memref<8x4xf32, #tpu.memory_space<vmem>>, %arg2: memref<2x8xf32, #tpu.memory_space<vmem>>) attributes {dimension_semantics = [], scalar_prefetch = 0 : i64, scratch_operands = 0 : i64, tpu.core_type = #tpu.core_type<tc>} {
    %c0 = arith.constant 0 : index
    %c0_0 = arith.constant 0 : index
    %c0_1 = arith.constant 0 : index
    %0 = vector.load %arg0[%c0, %c0_0, %c0_1] : memref<2x4x256xf32, #tpu.memory_space<vmem>>, vector<2x4x256xf32>
    %cst = arith.constant dense<0.000000e+00> : vector<2x4xf32>
    %1 = vector.multi_reduction <add>, %0, %cst [2] : vector<2x4x256xf32> to vector<2x4xf32>
    %cst_2 = arith.constant 3.906250e-03 : f32
    %2 = vector.broadcast %cst_2 : f32 to vector<2x4xf32>
    %3 = arith.mulf %1, %2 : vector<2x4xf32>
    %c0_3 = arith.constant 0 : index
    %c0_4 = arith.constant 0 : index
    %4 = vector.load %arg1[%c0_3, %c0_4] : memref<8x4xf32, #tpu.memory_space<vmem>>, vector<8x4xf32>
    %cst_5 = arith.constant dense<0.000000e+00> : vector<2x8xf32>
    %5 = tpu.matmul %3, %4, %cst_5 {dimension_numbers = #tpu.dot_dimension_numbers<[1], [1], [0], [0], [0, 0, 1, 0], [], []>} : vector<2x4xf32>, vector<8x4xf32>, vector<2x8xf32> -> vector<2x8xf32>
    %cst_6 = arith.constant 0.000000e+00 : f32
    %6 = vector.broadcast %cst_6 : f32 to vector<2x8xf32>
    %7 = arith.cmpf oge, %5, %6 : vector<2x8xf32>
    %cst_7 = arith.constant 1.562500e-02 : f32
    %8 = vector.broadcast %cst_7 : f32 to vector<2x8xf32>
    %9 = arith.mulf %5, %8 : vector<2x8xf32>
    %10 = arith.select %7, %5, %9 : vector<2x8xi1>, vector<2x8xf32>
    %c0_8 = arith.constant 0 : index
    %c0_9 = arith.constant 0 : index
    %11 = vector.load %arg2[%c0_8, %c0_9] : memref<2x8xf32, #tpu.memory_space<vmem>>, vector<2x8xf32>
    tpu.vector_store %arg2[%c0_8, %c0_9], %10 {strides = array<i32>} : memref<2x8xf32, #tpu.memory_space<vmem>>, vector<2x8xf32>,
    return
  }
}

</mosaic_0001>

<bundles_post_ra>
// kernel: tpu_custom_call.1
= control target key start
LH: loop header
LB: loop body
LE: loop exit
PB: predicated region body
PF: predicated region fallthrough
CT: control target
= control target key end

     0   :  { %7 = vsyncpa [#allocation3], 0  ;;  %s273_s0 = inlined_call_operand.hbm [shape: f32[2,4,256], index: 0, kind: input, shape index: {}]   ;;  %s274_s1 = inlined_call_operand.vmem [shape: f32[8,4], index: 1, kind: input, shape index: {}]   ;;  %s275_s2 = inlined_call_operand.hbm [shape: f32[2,8], index: 2, kind: output, shape index: {}]  }
   0x1   :  { %8 = vsyncpa [#allocation4], 0  ;;  %s223_s9 = smov [#allocation2]   ;;  %s175_s13 = scalar_lea.hbm %s273_s0, 256 }
   0x2   :  { %s14_s10 = sshll.u32 %s223_s9, 4  ;;  %p176_p0 = scmp.ne.s32.totalorder %s273_s0, %s175_s13  ;;  %s15_s10 = int_to_ptr.vmem [resolvable:$true] %s14_s10 }
   0x3   :  { %p179_p1 = scmp.lt.u32.totalorder %s175_s13, %s273_s0 }
   0x5   :  { %p181_p2 = pnand %p179_p1, %p176_p0 }
   0x7   :  { %184 = shalt.err (!%p181_p2)
}
   0x8   :  { %s185_s18 = scalar_lea.vmem %s15_s10, 256  ;;  %p190_p4 = scmp.lt.s32.totalorder %s15_s10, %s15_s10 }
   0x9   :  { %p186_p3 = scmp.ne.s32.totalorder %s15_s10, %s185_s18  ;;  %p191_p5 = scmp.lt.s32.totalorder %s185_s18, %s185_s18 }
   0xb   :  { %p192_p6 = por %p191_p5, %p190_p4 }
   0xd   :  { %p193_p7 = pnand %p192_p6, %p186_p3 }
   0xf   :  { %196 = shalt.err (!%p193_p7)
}
  0x10   :  { %s224_s19 = smov 128   ;;  %s225_s20 = smov 8  }
  0x11   :  { %20 = dma.hbm_to_vmem [thread:$0]  %s273_s0, 256, %s15_s10, [#allocation3], %s224_s19, %s224_s19, %s225_s20  }
  0x12   :  { %219 = dma.done.wait [#allocation3], 256  }
  0x13   :  { %220 = vsyncadd [#allocation3], 4294967040  ;;  %vm34_vm0 = vcmask 1043456   ;;  %v26_v0 = vld [vmem:[#allocation2] sm:$0xff]  ;;  %v27_v1 = vld [vmem:[#allocation2 + $0x8] sm:$0xff]  ;;  %v226_v10 = vmov 0.0   ;;  %v50_v12 = vlaneseq }
  0x14   :  { %v30_v2 = vcombine.high %v26_v0, %v26_v0  ;;  %v35_v3 = vsel %vm34_vm0, %v26_v0, 0.0  ;;  %v31_v4 = vcombine.high %v27_v1, %v27_v1  ;;  %v40_v6 = vsel %vm34_vm0, %v27_v1, 0.0  ;;  %162 = vmatprep.subr.mxu0 %v226_v10  ;;  %v47_v11 = vld [vmem:[%s274_s1] sm:$0xff]  ;;  %s228_s0 = smov [#allocation5]  }
  0x15   :  { %vm62_vm1 = vcmask 31744   ;;  %vm227_vm2 = vmmov 0   ;;  %v51_v13 = vand.u32 127, %v50_v12  ;;  %v53_v14 = vshrl.u32 %v50_v12, 7  ;;  %s149_s1 = sshll.u32 %s228_s0, 4  ;;  %s150_s1 = int_to_ptr.vmem [resolvable:$true] %s149_s1 }
  0x16   :  { %v36_v5 = vsel %vm34_vm0, %v30_v2, 0.0  ;;  %v41_v7 = vsel %vm34_vm0, %v31_v4, 0.0  ;;  %163 = vmatpush3.xpose.msk.msra.mxu0 %vm62_vm1, %v47_v11  ;;  %164 = vmatprep.mubr.msk.f32.mxu0 %vm227_vm2, %v226_v10  ;;  %vm60_vm3 = vcmask 1041409   ;;  %vm141_vm5 = vcmask 58368   ;;  %s197_s25 = scalar_lea.vmem %s150_s1, 32  ;;  %p202_p9 = scmp.lt.s32.totalorder %s150_s1, %s150_s1 }
  0x17   :  { %v37_v8 = vadd.f32 %v36_v5, %v35_v3  ;;  %v42_v9 = vadd.f32 %v41_v7, %v40_v6  ;;  %v54_v16 = vsub.s32 %v51_v13, %v53_v14  ;;  %p198_p8 = scmp.ne.s32.totalorder %s150_s1, %s197_s25  ;;  %p203_p10 = scmp.lt.s32.totalorder %s197_s25, %s197_s25 }
  0x19   :  { %38 = vadd.xlane.f32.xlu0 %v37_v8  ;;  %p204_p11 = por %p203_p10, %p202_p9 }
  0x1b   :  { %p205_p12 = pnand %p204_p11, %p198_p8 }
  0x1d   :  { %43 = vadd.xlane.f32.xlu0 %v42_v9 }
  0xa6   :  { %v39_v15 = vpop.xlane.xlu0 %38 }
  0xa7   :  { %v45_v17 = vmul.f32 0.00390625, %v39_v15 }
  0xa9   :  { %v55_v20 = vrot.slane %v45_v17, %v54_v16 }
  0xaa   :  { %v44_v18 = vpop.xlane.xlu0 %43 }
  0xab   :  { %v46_v19 = vmul.f32 0.00390625, %v44_v18 }
  0xad   :  { %v59_v21 = vrot.slane %v46_v19, %v54_v16 }
  0xaf   :  { %v61_v22 = vsel %vm60_vm3, %v59_v21, %v55_v20 }
  0xb0   :  { %165 = vmatmul.mubr.msk.f32.vlgmr.msra.gmra.mrb[0].mxu0 %vm62_vm1, %v61_v22 }
 0x183   :  { %v134_v23 = vpop.f32.mrb[0].mxu0 }
 0x184   :  { %vm138_vm4 = vcmp.ge.f32.partialorder %v134_v23, 0.0  ;;  %v139_v24 = vmul.f32 0.015625, %v134_v23  ;;  %v166_v25 = vpop.f32.mrb[1].mxu0 }
 0x186   :  { %v140_v26 = vsel %vm138_vm4, %v134_v23, %v139_v24 }
 0x187   :  { %142 = vst.msk [vmem:[#allocation5] sm:$0x3] %vm141_vm5, %v140_v26 }
 0x188   :  { %208 = shalt.err (!%p205_p12)
}
 0x189   :  { %s209_s28 = scalar_lea.hbm %s275_s2, 32 }
 0x18a   :  { %p210_p13 = scmp.ne.s32.totalorder %s275_s2, %s209_s28  ;;  %p213_p0 = scmp.lt.u32.totalorder %s209_s28, %s275_s2 }
 0x18c   :  { %p215_p1 = pnand %p213_p0, %p210_p13 }
 0x18e   :  { %218 = shalt.err (!%p215_p1)
}
 0x18f   :  { %152 = dma.vmem_to_hbm [thread:$0]  %s150_s1, 32, %s275_s2, [#allocation4]  }
 0x190   :  { %221 = dma.done.wait [#allocation4], 32  }
 0x191   :  { %222 = vsyncadd [#allocation4], 4294967264 }
 0x192   :  { %156 = vsyncpa [#allocation3], 1 }
 0x193   :  { %157 = vsyncpa [#allocation4], 1 }

</bundles_post_ra>
